<compile_context>
chip_gen: v6e
topology: v6e:2x2x1
jax: 0.10.0
libtpu: 0.0.40
codegen_flags: <defaults>
</compile_context>

<pallas_src>
import functools

import jax
import jax.numpy as jnp
from jax.experimental import pallas as pl
from jax.experimental.pallas import tpu as pltpu

GAMMA = 1.5   # module default; the kernel hard-codes t**1.5 == t*sqrt(t)
ALPHA = 0.25
LANES = 128


def _round_up(x, m):
    return (x + m - 1) // m * m


def _cdiv(a, b):
    return -(-a // b)


def _focal_loss_kernel(pred_ref, true_ref, out_ref, acc_ref, *,
                       total_n, rows, tile_rows, inner_steps):
    p_i = pl.program_id(0)          # parallel chunk (megacore shard on v7x)
    j = pl.program_id(1)            # streaming reduction step inside chunk

    @pl.when(j == 0)
    def _():
        acc_ref[...] = jnp.zeros_like(acc_ref)

    x = pred_ref[...].astype(jnp.float32)    # logits
    z = true_ref[...].astype(jnp.float32)    # targets in [0, 1]

    # Shared transcendental: e = exp(-|x|) (one EUP op reused twice).
    e = jnp.exp(-jnp.abs(x))

    # Numerically stable BCE-with-logits: max(x,0) - x*z + log1p(exp(-|x|)).
    bce = jnp.maximum(x, 0.0) - x * z + jnp.log1p(e)

    # Exact-form sigmoid from e, with an EUP approx reciprocal instead of a
    # VPU divide:  x>=0 -> 1/(1+e),  x<0 -> e/(1+e).
    inv = pl.reciprocal(1.0 + e, approx=True)
    pred_prob = jnp.where(x >= 0.0, inv, e * inv)

    # Fused factor algebra:
    #   1 - p_t      = p + z - 2*z*p
    #   alpha_factor = (1-ALPHA) + (2*ALPHA-1)*z
    omt = jnp.maximum(pred_prob + z - 2.0 * z * pred_prob, 0.0)  # clamp: sqrt
    alpha_factor = (1.0 - ALPHA) + (2.0 * ALPHA - 1.0) * z
    modulating_factor = omt * jnp.sqrt(omt)     # (1 - p_t)**1.5, no pow
    loss = bce * alpha_factor * modulating_factor

    # Number of valid rows in this block (scalar int32).  Interior blocks take
    # the cheap unmasked path; only a ragged/overflow tail block pays for the
    # iota + select mask (covers garbage rows of a partial boundary block and
    # duplicate overflow steps of an uneven parallel split).
    t = p_i * inner_steps + j
    rem = rows - t * tile_rows

    @pl.when(rem >= tile_rows)
    def _():
        acc_ref[...] += jnp.sum(loss.reshape(tile_rows // 8, 8, LANES), axis=0)

    @pl.when(rem < tile_rows)
    def _():
        row_ids = jax.lax.broadcasted_iota(jnp.int32, loss.shape, 0)
        masked = jnp.where(row_ids < rem, loss, 0.0)
        acc_ref[...] += jnp.sum(masked.reshape(tile_rows // 8, 8, LANES),
                                axis=0)

    @pl.when(j == pl.num_programs(1) - 1)
    def _():
        # Per-chunk partial mean; the wrapper sums the chunk outputs.
        out_ref[0, 0] = jnp.sum(acc_ref[...]) / jnp.float32(total_n)


def _default_num_parallel():
    # Only v7x has 2 TensorCores per chip; on 1-TC chips (v5e/v6e) a parallel
    # split is just a serial re-partition of the reduction (pure overhead).
    try:
        kind = jax.devices()[0].device_kind.lower()
    except Exception:
        return 1
    return 2 if "7" in kind else 1


def focal_loss(pred, true, *, tile_rows=4096, num_parallel=None):
    """Mean focal loss (gamma=1.5, alpha=0.25) over all elements.

    pred / true: arrays of identical shape; any float dtype (bf16 inputs are
    streamed as-is and cast to f32 inside the kernel).
    """
    # TODO(synk): only the module's default reduction path ('mean', inherited
    # from BCEWithLogitsLoss) is implemented; 'sum'/'none' are not.
    assert pred.shape == true.shape
    total_n = int(pred.size)

    if num_parallel is None:
        num_parallel = _default_num_parallel()

    pred_flat = pred.reshape(-1)
    true_flat = true.reshape(-1)

    # Lane-dense layout: (rows, 128).  Pad the tail only when N is not a lane
    # multiple (or the array is tiny): padded (logit=-100, target=0) elements
    # have exactly zero focal loss, so no per-element lane mask is needed.
    # When N % 128 == 0 and rows >= 8 this is a free reshape (no HBM copy).
    rows = max(8, _cdiv(total_n, LANES))
    pad = rows * LANES - total_n
    if pad:
        pred_flat = jnp.pad(pred_flat, (0, pad), constant_values=-100.0)
        true_flat = jnp.pad(true_flat, (0, pad), constant_values=0.0)
    pred2 = pred_flat.reshape(rows, LANES)
    true2 = true_flat.reshape(rows, LANES)

    # Tiling (static Python ints).  4096 rows = 2 MiB/block; with 2 inputs x 2
    # pipeline buffers that is 8 MiB live -> fits v5e's 16 MiB default scoped
    # VMEM and v6e/v7x's 32 MiB without raising vmem_limit_bytes.
    tile_rows = max(8, min(_round_up(tile_rows, 8), rows - rows % 8))
    total_tiles = _cdiv(rows, tile_rows)
    num_parallel = max(1, min(num_parallel, total_tiles))
    inner_steps = _cdiv(total_tiles, num_parallel)

    if num_parallel * inner_steps != total_tiles:
        # Overflow steps of the last chunk re-read the final tile; their
        # contribution is masked to zero in the kernel (rem <= 0).
        in_map = lambda p, j: (jnp.minimum(p * inner_steps + j,
                                           total_tiles - 1), 0)
    else:
        in_map = lambda p, j: (p * inner_steps + j, 0)

    kernel = functools.partial(_focal_loss_kernel, total_n=total_n,
                               rows=rows, tile_rows=tile_rows,
                               inner_steps=inner_steps)

    partials = pl.pallas_call(
        kernel,
        out_shape=jax.ShapeDtypeStruct((num_parallel, 1), jnp.float32),
        grid_spec=pltpu.PrefetchScalarGridSpec(
            num_scalar_prefetch=0,
            grid=(num_parallel, inner_steps),
            in_specs=[
                pl.BlockSpec((tile_rows, LANES), in_map),
                pl.BlockSpec((tile_rows, LANES), in_map),
            ],
            out_specs=pl.BlockSpec(
                (1, 1), lambda p, j: (p, 0), memory_space=pltpu.SMEM),
            scratch_shapes=[pltpu.VMEM((8, LANES), jnp.float32)],
        ),
        compiler_params=pltpu.CompilerParams(
            dimension_semantics=("parallel", "arbitrary")),
    )(pred2, true2)

    # Per-chunk partial means sum to the global mean.
    return jnp.sum(partials)


def _focal_loss_ref(pred, true):
    """Pure-JAX reference mirroring the PyTorch module (reduction='mean')."""
    x = pred.astype(jnp.float32)
    z = true.astype(jnp.float32)
    bce = jnp.maximum(x, 0.0) - x * z + jnp.log1p(jnp.exp(-jnp.abs(x)))
    p = jax.nn.sigmoid(x)
    p_t = z * p + (1.0 - z) * (1.0 - p)
    alpha_factor = z * ALPHA + (1.0 - z) * (1.0 - ALPHA)
    mod = (1.0 - p_t) ** GAMMA
    return jnp.mean(bce * alpha_factor * mod)


def _check(out, ref, tag):
    # approx=True reciprocal -> loosen tolerance slightly vs exact-divide ref.
    assert jnp.allclose(out, ref, rtol=2e-3, atol=1e-6), (tag, out, ref)


if __name__ == "__main__":
    key = jax.random.PRNGKey(0)
    k1, k2, k3, k4 = jax.random.split(key, 4)

    # NCHW logits / 0-1 targets, like the module's YOLOX usage.
    B, C, H, W = 2, 4, 16, 16
    pred = jax.random.normal(k1, (B, C, H, W), dtype=jnp.float32)
    true = (jax.random.uniform(k2, (B, C, H, W)) > 0.5).astype(jnp.float32)
    ref = jax.block_until_ready(_focal_loss_ref(pred, true))

    # 1) Exact-multiple case, default tiling (single block, no pad, no mask).
    out = jax.block_until_ready(focal_loss(pred, true))
    _check(out, ref, "default")

    # 2) Multi-step streaming reduction (grid (1, 2)).
    out = jax.block_until_ready(focal_loss(pred, true, tile_rows=8,
                                           num_parallel=1))
    _check(out, ref, "multi-step")

    # 3) Parallel-chunk path with per-chunk partial means (grid (2, 1)).
    out = jax.block_until_ready(focal_loss(pred, true, tile_rows=8,
                                           num_parallel=2))
    _check(out, ref, "parallel")

    # 4) Ragged case (1155 elements): lane-tail pad (-100/0) + masked tail.
    pred_r = jax.random.normal(k3, (3, 5, 7, 11), dtype=jnp.float32)
    true_r = (jax.random.uniform(k4, (3, 5, 7, 11)) > 0.5).astype(jnp.float32)
    out_r = jax.block_until_ready(focal_loss(pred_r, true_r))
    ref_r = jax.block_until_ready(_focal_loss_ref(pred_r, true_r))
    _check(out_r, ref_r, "ragged")

    print("KERNEL_OK")
</pallas_src>

<mosaic_0001>
module attributes {stable_mosaic.version = 11 : i64} {
  func.func @_focal_loss_kernel(%arg0: i32, %arg1: i32, %arg2: memref<16x128xf32, #tpu.memory_space<vmem>>, %arg3: memref<16x128xf32, #tpu.memory_space<vmem>>, %arg4: memref<1x1xf32, #tpu.memory_space<smem>>, %arg5: memref<8x128xf32, #tpu.memory_space<vmem>>) attributes {dimension_semantics = [#tpu.dimension_semantics<parallel>, #tpu.dimension_semantics<arbitrary>], iteration_bounds = array<i64: 1, 1>, scalar_prefetch = 0 : i64, scratch_operands = 1 : i64, tpu.core_type = #tpu.core_type<tc>, window_params = [{transform_indices = @transform_0, window_bounds = array<i64: 16, 128>}, {transform_indices = @transform_1, window_bounds = array<i64: 16, 128>}, {transform_indices = @transform_2, window_bounds = array<i64: 1, 1>}]} {
    %c0_i32 = arith.constant 0 : i32
    %0 = arith.cmpi eq, %arg1, %c0_i32 : i32
    %1 = arith.extui %0 : i1 to i32
    %c0_i32_0 = arith.constant 0 : i32
    %2 = arith.cmpi ne, %1, %c0_i32_0 : i32
    scf.if %2 {
      %cst_18 = arith.constant 0.000000e+00 : f32
      %50 = vector.broadcast %cst_18 : f32 to vector<8x128xf32>
      %c0_19 = arith.constant 0 : index
      %c0_20 = arith.constant 0 : index
      %51 = vector.load %arg5[%c0_19, %c0_20] : memref<8x128xf32, #tpu.memory_space<vmem>>, vector<8x128xf32>
      tpu.vector_store %arg5[%c0_19, %c0_20], %50 {strides = array<i32>} : memref<8x128xf32, #tpu.memory_space<vmem>>, vector<8x128xf32>,
    } else {
    }
    %c0 = arith.constant 0 : index
    %c0_1 = arith.constant 0 : index
    %3 = vector.load %arg2[%c0, %c0_1] : memref<16x128xf32, #tpu.memory_space<vmem>>, vector<16x128xf32>
    %c0_2 = arith.constant 0 : index
    %c0_3 = arith.constant 0 : index
    %4 = vector.load %arg3[%c0_2, %c0_3] : memref<16x128xf32, #tpu.memory_space<vmem>>, vector<16x128xf32>
    %5 = math.absf %3 : vector<16x128xf32>
    %cst = arith.constant 0.000000e+00 : f32
    %6 = vector.broadcast %cst : f32 to vector<16x128xf32>
    %7 = arith.subf %6, %5 : vector<16x128xf32>
    %8 = math.exp %7 : vector<16x128xf32>
    %cst_4 = arith.constant 0.000000e+00 : f32
    %9 = vector.broadcast %cst_4 : f32 to vector<16x128xf32>
    %10 = arith.maximumf %3, %9 : vector<16x128xf32>
    %11 = arith.mulf %3, %4 : vector<16x128xf32>
    %12 = arith.subf %10, %11 : vector<16x128xf32>
    %13 = math.log1p %8 : vector<16x128xf32>
    %14 = arith.addf %12, %13 : vector<16x128xf32>
    %cst_5 = arith.constant 1.000000e+00 : f32
    %15 = vector.broadcast %cst_5 : f32 to vector<16x128xf32>
    %16 = arith.addf %15, %8 : vector<16x128xf32>
    %17 = tpu.reciprocal %16 {approx = true} : vector<16x128xf32> -> vector<16x128xf32>
    %cst_6 = arith.constant 0.000000e+00 : f32
    %18 = vector.broadcast %cst_6 : f32 to vector<16x128xf32>
    %19 = arith.cmpf oge, %3, %18 : vector<16x128xf32>
    %20 = arith.mulf %8, %17 : vector<16x128xf32>
    %21 = arith.select %19, %17, %20 : vector<16x128xi1>, vector<16x128xf32>
    %22 = arith.addf %21, %4 : vector<16x128xf32>
    %cst_7 = arith.constant 2.000000e+00 : f32
    %23 = vector.broadcast %cst_7 : f32 to vector<16x128xf32>
    %24 = arith.mulf %23, %4 : vector<16x128xf32>
    %25 = arith.mulf %24, %21 : vector<16x128xf32>
    %26 = arith.subf %22, %25 : vector<16x128xf32>
    %cst_8 = arith.constant 0.000000e+00 : f32
    %27 = vector.broadcast %cst_8 : f32 to vector<16x128xf32>
    %28 = arith.maximumf %26, %27 : vector<16x128xf32>
    %cst_9 = arith.constant -5.000000e-01 : f32
    %29 = vector.broadcast %cst_9 : f32 to vector<16x128xf32>
    %30 = arith.mulf %29, %4 : vector<16x128xf32>
    %cst_10 = arith.constant 7.500000e-01 : f32
    %31 = vector.broadcast %cst_10 : f32 to vector<16x128xf32>
    %32 = arith.addf %31, %30 : vector<16x128xf32>
    %33 = math.sqrt %28 : vector<16x128xf32>
    %34 = arith.mulf %28, %33 : vector<16x128xf32>
    %35 = arith.mulf %14, %32 : vector<16x128xf32>
    %36 = arith.mulf %35, %34 : vector<16x128xf32>
    %c1_i32 = arith.constant 1 : i32
    %37 = arith.muli %arg0, %c1_i32 : i32
    %38 = arith.addi %37, %arg1 : i32
    %c16_i32 = arith.constant 16 : i32
    %39 = arith.muli %38, %c16_i32 : i32
    %c16_i32_11 = arith.constant 16 : i32
    %40 = arith.subi %c16_i32_11, %39 : i32
    %c16_i32_12 = arith.constant 16 : i32
    %41 = arith.cmpi sge, %40, %c16_i32_12 : i32
    %42 = arith.extui %41 : i1 to i32
    %c0_i32_13 = arith.constant 0 : i32
    %43 = arith.cmpi ne, %42, %c0_i32_13 : i32
    scf.if %43 {
      %c0_18 = arith.constant 0 : index
      %c0_19 = arith.constant 0 : index
      %50 = vector.load %arg5[%c0_18, %c0_19] : memref<8x128xf32, #tpu.memory_space<vmem>>, vector<8x128xf32>
      %51 = vector.shape_cast %36 : vector<16x128xf32> to vector<2x8x128xf32>
      %cst_20 = arith.constant dense<0.000000e+00> : vector<8x128xf32>
      %52 = vector.multi_reduction <add>, %51, %cst_20 [0] : vector<2x8x128xf32> to vector<8x128xf32>
      %53 = arith.addf %50, %52 : vector<8x128xf32>
      %c0_21 = arith.constant 0 : index
      %c0_22 = arith.constant 0 : index
      %54 = vector.load %arg5[%c0_21, %c0_22] : memref<8x128xf32, #tpu.memory_space<vmem>>, vector<8x128xf32>
      tpu.vector_store %arg5[%c0_21, %c0_22], %53 {strides = array<i32>} : memref<8x128xf32, #tpu.memory_space<vmem>>, vector<8x128xf32>,
    } else {
    }
    %c16_i32_14 = arith.constant 16 : i32
    %44 = arith.cmpi slt, %40, %c16_i32_14 : i32
    %45 = arith.extui %44 : i1 to i32
    %c0_i32_15 = arith.constant 0 : i32
    %46 = arith.cmpi ne, %45, %c0_i32_15 : i32
    scf.if %46 {
      %50 = tpu.iota {dimensions = array<i32: 0>} : vector<16x128xi32>
      %51 = vector.broadcast %40 : i32 to vector<16x128xi32>
      %52 = arith.cmpi slt, %50, %51 : vector<16x128xi32>
      %cst_18 = arith.constant 0.000000e+00 : f32
      %53 = vector.broadcast %cst_18 : f32 to vector<16x128xf32>
      %54 = arith.select %52, %36, %53 : vector<16x128xi1>, vector<16x128xf32>
      %c0_19 = arith.constant 0 : index
      %c0_20 = arith.constant 0 : index
      %55 = vector.load %arg5[%c0_19, %c0_20] : memref<8x128xf32, #tpu.memory_space<vmem>>, vector<8x128xf32>
      %56 = vector.shape_cast %54 : vector<16x128xf32> to vector<2x8x128xf32>
      %cst_21 = arith.constant dense<0.000000e+00> : vector<8x128xf32>
      %57 = vector.multi_reduction <add>, %56, %cst_21 [0] : vector<2x8x128xf32> to vector<8x128xf32>
      %58 = arith.addf %55, %57 : vector<8x128xf32>
      %c0_22 = arith.constant 0 : index
      %c0_23 = arith.constant 0 : index
      %59 = vector.load %arg5[%c0_22, %c0_23] : memref<8x128xf32, #tpu.memory_space<vmem>>, vector<8x128xf32>
      tpu.vector_store %arg5[%c0_22, %c0_23], %58 {strides = array<i32>} : memref<8x128xf32, #tpu.memory_space<vmem>>, vector<8x128xf32>,
    } else {
    }
    %c0_i32_16 = arith.constant 0 : i32
    %47 = arith.cmpi eq, %arg1, %c0_i32_16 : i32
    %48 = arith.extui %47 : i1 to i32
    %c0_i32_17 = arith.constant 0 : i32
    %49 = arith.cmpi ne, %48, %c0_i32_17 : i32
    scf.if %49 {
      %c0_18 = arith.constant 0 : index
      %c0_19 = arith.constant 0 : index
      %50 = vector.load %arg5[%c0_18, %c0_19] : memref<8x128xf32, #tpu.memory_space<vmem>>, vector<8x128xf32>
      %51 = vector.shape_cast %50 : vector<8x128xf32> to vector<1x8x128xf32>
      %cst_20 = arith.constant dense<0.000000e+00> : vector<1xf32>
      %52 = vector.multi_reduction <add>, %51, %cst_20 [1, 2] : vector<1x8x128xf32> to vector<1xf32>
      %53 = vector.shape_cast %52 : vector<1xf32> to vector<1x1x1xf32>
      %54 = vector.extract %53[0, 0, 0] : f32 from vector<1x1x1xf32>
      %cst_21 = arith.constant 2.048000e+03 : f32
      %55 = arith.divf %54, %cst_21 : f32
      %c0_22 = arith.constant 0 : index
      %c0_23 = arith.constant 0 : index
      %56 = memref.load %arg4[%c0_22, %c0_23] : memref<1x1xf32, #tpu.memory_space<smem>>
      memref.store %55, %arg4[%c0_22, %c0_23] : memref<1x1xf32, #tpu.memory_space<smem>>
    } else {
    }
    return
  }
  func.func @transform_0(%arg0: i32, %arg1: i32) -> (i32, i32) {
    %c1_i32 = arith.constant 1 : i32
    %0 = arith.muli %arg0, %c1_i32 : i32
    %1 = arith.addi %0, %arg1 : i32
    %c0_i32 = arith.constant 0 : i32
    %c0_i32_0 = arith.constant 0 : i32
    return %1, %c0_i32 : i32, i32
  }
  func.func @transform_1(%arg0: i32, %arg1: i32) -> (i32, i32) {
    %c1_i32 = arith.constant 1 : i32
    %0 = arith.muli %arg0, %c1_i32 : i32
    %1 = arith.addi %0, %arg1 : i32
    %c0_i32 = arith.constant 0 : i32
    %c0_i32_0 = arith.constant 0 : i32
    return %1, %c0_i32 : i32, i32
  }
  func.func @transform_2(%arg0: i32, %arg1: i32) -> (i32, i32) {
    %c0_i32 = arith.constant 0 : i32
    %c0_i32_0 = arith.constant 0 : i32
    return %arg0, %c0_i32 : i32, i32
  }
}

</mosaic_0001>

<bundles_post_ra>
// kernel: tpu_custom_call.1
= control target key start
LH: loop header
LB: loop body
LE: loop exit
PB: predicated region body
PF: predicated region fallthrough
CT: control target
= control target key end

     0   :  { %7 = vsyncpa [#allocation4], 0  ;;  %s305_s0 = inlined_call_operand.hbm [shape: f32[16,128], index: 0, kind: input, shape index: {}]   ;;  %s306_s1 = inlined_call_operand.hbm [shape: f32[16,128], index: 1, kind: input, shape index: {}]   ;;  %s307_s2 = inlined_call_operand.hbm [shape: f32[1,1], index: 2, kind: output, shape index: {}]  }
   0x1   :  { %8 = vsyncpa [#allocation7], 0 }
   0x2   :  { %9 = vsyncpa [#allocation5], 0  ;;  %s276_s9 = smov [#allocation3]  }
   0x3   :  { %s19_s10 = sshll.u32 %s276_s9, 4  ;;  %s20_s10 = int_to_ptr.vmem [resolvable:$true] %s19_s10 }
   0x4   :  { %s230_s11 = scalar_lea.vmem %s20_s10, 256  ;;  %p235_p1 = scmp.lt.s32.totalorder %s20_s10, %s20_s10 }
   0x5   :  { %p231_p0 = scmp.ne.s32.totalorder %s20_s10, %s230_s11  ;;  %p236_p2 = scmp.lt.s32.totalorder %s230_s11, %s230_s11 }
   0x7   :  { %p237_p3 = por %p236_p2, %p235_p1 }
   0x9   :  { %p238_p4 = pnand %p237_p3, %p231_p0 }
   0xb   :  { %241 = shalt.err (!%p238_p4)
}
   0xc   :  { %s277_s12 = smov 128   ;;  %s278_s13 = smov 8  }
   0xd   :  { %25 = dma.hbm_to_vmem [thread:$0]  %s305_s0, 256, %s20_s10, [#allocation4], %s277_s12, %s277_s12, %s278_s13  }
   0xe   :  { %s279_s16 = smov [#allocation6]  }
   0xf   :  { %s35_s17 = sshll.u32 %s279_s16, 4  ;;  %s36_s17 = int_to_ptr.vmem [resolvable:$true] %s35_s17 }
  0x10   :  { %s250_s18 = scalar_lea.vmem %s36_s17, 256  ;;  %p255_p6 = scmp.lt.s32.totalorder %s36_s17, %s36_s17 }
  0x11   :  { %p251_p5 = scmp.ne.s32.totalorder %s36_s17, %s250_s18  ;;  %p256_p7 = scmp.lt.s32.totalorder %s250_s18, %s250_s18 }
  0x13   :  { %p257_p8 = por %p256_p7, %p255_p6 }
  0x15   :  { %p258_p9 = pnand %p257_p8, %p251_p5 }
  0x17   :  { %261 = shalt.err (!%p258_p9)
}
  0x18   :  { %41 = dma.hbm_to_vmem [thread:$0]  %s306_s1, 256, %s36_s17, [#allocation7], %s277_s12, %s277_s12, %s278_s13  }
  0x19   :  { %270 = dma.done.wait [#allocation4], 256  }
  0x1a   :  { %271 = vsyncadd [#allocation4], 4294967040 }
  0x1b   :  { %272 = dma.done.wait [#allocation7], 256  }
  0x1c   :  { %273 = vsyncadd [#allocation7], 4294967040  ;;  %v57_v0 = vld [vmem:[#allocation3] sm:$0xff]  ;;  %v58_v1 = vld [vmem:[#allocation3 + $0x8] sm:$0xff]  ;;  %s280_s21 = smov [#allocation8]  }
  0x1d   :  { %v61_v2 = vand.u32 2147483647, %v57_v0  ;;  %v62_v3 = vand.u32 2147483647, %v58_v1  ;;  %v59_v12 = vld [vmem:[#allocation6] sm:$0xff]  ;;  %v60_v13 = vld [vmem:[#allocation6 + $0x8] sm:$0xff] }
  0x1e   :  { %vm99_vm0 = vcmp.ge.f32.partialorder %v57_v0, 0.0  ;;  %v107_v15 = vmul.f32 2.0, %v59_v12  ;;  %vm100_vm1 = vcmp.ge.f32.partialorder %v58_v1, 0.0  ;;  %v108_v18 = vmul.f32 2.0, %v60_v13 }
  0x1f   :  { %v63_v4 = vsub.f32 0.0, %v61_v2  ;;  %v64_v5 = vsub.f32 0.0, %v62_v3  ;;  %v69_v38 = vmax.f32 %v57_v0, 0.0  ;;  %v71_v39 = vmul.f32 %v59_v12, %v57_v0 }
  0x20   :  { %v70_v40 = vmax.f32 %v58_v1, 0.0  ;;  %v72_v41 = vmul.f32 %v60_v13, %v58_v1  ;;  %v115_v47 = vmul.f32 -0.5, %v59_v12  ;;  %v116_v50 = vmul.f32 -0.5, %v60_v13 }
  0x21   :  { %v65_v6 = vmul.f32 1.442695, %v63_v4  ;;  %v67_v7 = vmul.f32 1.442695, %v64_v5  ;;  %v73_v46 = vsub.f32 %v69_v38, %v71_v39 }
  0x22   :  { %v74_v48 = vsub.f32 %v70_v40, %v72_v41  ;;  %v117_v53 = vadd.f32 0.75, %v115_v47  ;;  %v118_v56 = vadd.f32 0.75, %v116_v50 }
  0x23   :  { %206 = vpow2.f32 %v65_v6 }
  0x24   :  { %208 = vpow2.f32 %v67_v7 }
  0x30   :  { %v207_v8 = vpop.eup %206 }
  0x31   :  { %v209_v9 = vpop.eup %208  ;;  %v75_v10 = vadd.f32 1.0, %v207_v8  ;;  %v78_v27 = vmul.f32 -0.5, %v207_v8  ;;  %v81_v34 = vand.u32 2147483647, %v207_v8 }
  0x32   :  { %v84_v11 = vadd.f32 1.0, %v209_v9  ;;  %v87_v29 = vmul.f32 -0.5, %v209_v9  ;;  %v90_v37 = vand.u32 2147483647, %v209_v9 }
  0x33   :  { %210 = vrcp.f32 %v75_v10  ;;  %v79_v32 = vadd.f32 1.0, %v78_v27  ;;  %vm82_vm2 = vcmp.lt.f32.partialorder %v81_v34, 0.0004427343 }
  0x34   :  { %212 = vrcp.f32 %v84_v11  ;;  %v88_v35 = vadd.f32 1.0, %v87_v29  ;;  %vm91_vm3 = vcmp.lt.f32.partialorder %v90_v37, 0.0004427343 }
  0x35   :  { %214 = vlog2.f32 %v75_v10  ;;  %v80_v43 = vmul.f32 %v207_v8, %v79_v32 }
  0x36   :  { %216 = vlog2.f32 %v84_v11  ;;  %v89_v45 = vmul.f32 %v209_v9, %v88_v35 }
  0x40   :  { %v211_v14 = vpop.eup %210 }
  0x41   :  { %v213_v16 = vpop.eup %212  ;;  %v101_v17 = vmul.f32 %v211_v14, %v207_v8 }
  0x42   :  { %v102_v19 = vmul.f32 %v213_v16, %v209_v9  ;;  %v215_v33 = vpop.eup %214 }
  0x43   :  { %v103_v20 = vsel %vm99_vm0, %v211_v14, %v101_v17  ;;  %v217_v36 = vpop.eup %216  ;;  %v77_v42 = vmul.f32 0.6931472, %v215_v33 }
  0x44   :  { %v104_v21 = vsel %vm100_vm1, %v213_v16, %v102_v19  ;;  %v105_v22 = vadd.f32 %v103_v20, %v59_v12  ;;  %v109_v23 = vmul.f32 %v107_v15, %v103_v20  ;;  %v86_v44 = vmul.f32 0.6931472, %v217_v36 }
  0x45   :  { %v106_v24 = vadd.f32 %v104_v21, %v60_v13  ;;  %v110_v25 = vmul.f32 %v108_v18, %v104_v21  ;;  %v83_v49 = vsel %vm82_vm2, %v80_v43, %v77_v42 }
  0x46   :  { %v111_v26 = vsub.f32 %v105_v22, %v109_v23  ;;  %v92_v51 = vsel %vm91_vm3, %v89_v45, %v86_v44  ;;  %v93_v52 = vadd.f32 %v83_v49, %v73_v46 }
  0x47   :  { %v112_v28 = vsub.f32 %v106_v24, %v110_v25  ;;  %v94_v55 = vadd.f32 %v92_v51, %v74_v48 }
  0x48   :  { %v113_v30 = vmax.f32 %v111_v26, 0.0  ;;  %v135_v63 = vmul.f32 %v117_v53, %v93_v52 }
  0x49   :  { %v114_v31 = vmax.f32 %v112_v28, 0.0  ;;  %v136_v2 = vmul.f32 %v118_v56, %v94_v55 }
  0x4a   :  { %218 = vrsqrt.f32 %v113_v30  ;;  %vm121_vm4 = vcmp.eq.f32.partialorder %v113_v30, inf  ;;  %v124_v57 = vand.u32 2147483648, %v113_v30  ;;  %vm123_vm5 = vcmp.eq.f32.partialorder %v113_v30, 0.0 }
  0x4b   :  { %220 = vrsqrt.f32 %v114_v31  ;;  %vm128_vm6 = vcmp.eq.f32.partialorder %v114_v31, inf  ;;  %v131_v60 = vand.u32 2147483648, %v114_v31  ;;  %vm130_vm7 = vcmp.eq.f32.partialorder %v114_v31, 0.0 }
  0x57   :  { %v219_v54 = vpop.eup %218 }
  0x58   :  { %v221_v58 = vpop.eup %220  ;;  %v120_v59 = vmul.f32 %v219_v54, %v113_v30 }
  0x59   :  { %v127_v61 = vmul.f32 %v221_v58, %v114_v31 }
  0x5a   :  { %v122_v62 = vsel %vm121_vm4, %v113_v30, %v120_v59 }
  0x5b   :  { %v125_v0 = vsel %vm123_vm5, %v124_v57, %v122_v62  ;;  %v129_v1 = vsel %vm128_vm6, %v114_v31, %v127_v61 }
  0x5c   :  { %v132_v3 = vsel %vm130_vm7, %v131_v60, %v129_v1  ;;  %v133_v4 = vmul.f32 %v125_v0, %v113_v30 }
  0x5d   :  { %v134_v5 = vmul.f32 %v132_v3, %v114_v31 }
  0x5e   :  { %v137_v6 = vmul.f32 %v135_v63, %v133_v4 }
  0x5f   :  { %v138_v7 = vmul.f32 %v136_v2, %v134_v5 }
  0x61   :  { %v147_v8 = vadd.f32 %v138_v7, %v137_v6 }
  0x63   :  { %170 = vadd.xlane.f32.xlu0 %v147_v8 }
  0xec   :  { %v171_v9 = vpop.xlane.xlu0 %170 }
  0xed   :  { %v172_v10 = vrot.slane %v171_v9, 4 }
  0xef   :  { %v173_v11 = vadd.f32 %v172_v10, %v171_v9 }
  0xf1   :  { %v174_v12 = vrot.slane %v173_v11, 2 }
  0xf3   :  { %v175_v13 = vadd.f32 %v174_v12, %v173_v11 }
  0xf5   :  { %v176_v14 = vrot.slane %v175_v13, 1 }
  0xf7   :  { %v177_v15 = vadd.f32 %v176_v14, %v175_v13 }
  0xf9   :  { %199 = vpush %v177_v15 }
 0x12a   :  { %s200_s0 = spop %199 }
 0x12b   :  { %s181_s1 = smul.f32 0.00048828125, %s200_s0 }
 0x12d   :  { %183 = sst [smem:[#allocation8]] %s181_s1 }
 0x12e   :  { %191 = dma.smem_to_hbm %s280_s21, 16, %s307_s2, [#allocation5]  }
 0x12f   :  { %274 = dma.done.wait [#allocation5], 16  }
 0x130   :  { %275 = vsyncadd [#allocation5], 4294967280 }
 0x131   :  { %195 = sfence }
 0x132   :  { %196 = vsyncpa [#allocation4], 1 }
 0x133   :  { %197 = vsyncpa [#allocation7], 1 }
 0x134   :  { %198 = vsyncpa [#allocation5], 1 }

</bundles_post_ra>
